<compile_context>
chip_gen: v5e
topology: v5e:2x2
jax: 0.10.0
libtpu: 0.0.40
codegen_flags: <defaults>
</compile_context>

<pallas_src>
import functools

import jax
import jax.numpy as jnp
from jax.experimental import pallas as pl
from jax.experimental.pallas import tpu as pltpu


def _pick_tile(n, candidates):
    for c in candidates:
        if n % c == 0:
            return c
    return n


# ---------------------------------------------------------------------------
# Kernel 1: fused grouped QKV projection (1x1 grouped Conv1d, seq-major)
# ---------------------------------------------------------------------------

def _qkv_proj_kernel(x_ref, w_ref, q_ref, kv_ref, *, heads, dim_head):
    # x_ref:  (1, 1, tn, d)          w_ref: (1, d, 3*h*dh)  [q | kv-half0 | kv-half1]
    # q_ref:  (1, h, tn, dh)         kv_ref: (1, 2*h, tn, dh)
    di = heads * dim_head
    x = x_ref[0, 0]                                   # (tn, d)  native dtype
    w = w_ref[0]                                      # (d, 3*di)
    prod = jnp.dot(x, w, preferred_element_type=jnp.float32)   # (tn, 3*di) f32
    prod = prod.astype(q_ref.dtype)
    for hi in range(heads):
        lo = hi * dim_head
        q_ref[0, hi] = prod[:, lo:lo + dim_head]
        kv_ref[0, hi] = prod[:, di + lo:di + lo + dim_head]
        kv_ref[0, heads + hi] = prod[:, 2 * di + lo:2 * di + lo + dim_head]


def qkv_projection(x, w_all, *, heads, dim_head, seq_tile=None):
    """x: (b, g, n, d), w_all: (g, d, 3*h*dh) ->
       q_hm  (b, g*h,   n, dh)   row = g*h + head
       kv_hm (b, 2*g*h, n, dh)   row = (2*g_src + half)*h + head"""
    b, g, n, d = x.shape
    di = heads * dim_head
    tn = seq_tile or _pick_tile(n, (512, 256, 128))
    assert n % tn == 0
    kernel = functools.partial(_qkv_proj_kernel, heads=heads, dim_head=dim_head)
    return pl.pallas_call(
        kernel,
        out_shape=(
            jax.ShapeDtypeStruct((b, g * heads, n, dim_head), x.dtype),
            jax.ShapeDtypeStruct((b, 2 * g * heads, n, dim_head), x.dtype),
        ),
        grid=(g, b, n // tn),                      # g outermost -> weight stays resident
        in_specs=[
            pl.BlockSpec((1, 1, tn, d), lambda jg, ib, it: (ib, jg, it, 0)),
            pl.BlockSpec((1, d, 3 * di), lambda jg, ib, it: (jg, 0, 0)),
        ],
        out_specs=(
            pl.BlockSpec((1, heads, tn, dim_head), lambda jg, ib, it: (ib, jg, it, 0)),
            pl.BlockSpec((1, 2 * heads, tn, dim_head), lambda jg, ib, it: (ib, jg, it, 0)),
        ),
        compiler_params=pltpu.CompilerParams(
            dimension_semantics=("parallel", "parallel", "parallel"),
            vmem_limit_bytes=48 * 1024 * 1024),
    )(x, w_all)


# ---------------------------------------------------------------------------
# Kernel 2: flash attention (heads packed) + fused output projection
# ---------------------------------------------------------------------------

def _flash_attn_kernel(q_ref, k_ref, v_ref, nk_ref, nv_ref, wo_ref, o_ref,
                       m_sc, l_sc, acc_sc, *, scale, heads):
    # q_ref: (1,h,tq,dh)  k_ref/v_ref: (1,h,tk,dh)  nk/nv: (1,h,1,dh)
    # wo_ref: (1,h,dh,d)  o_ref: (1,1,tq,d)
    ki = pl.program_id(3)
    q = q_ref[0]                                        # (h, tq, dh)

    @pl.when(ki == 0)
    def _init():
        # Fold the null key/value in as the "zeroth" KV column of the
        # online softmax (keeps the real KV length = n, lane-aligned).
        nk = nk_ref[0].astype(jnp.float32)              # (h, 1, dh)
        nv = nv_ref[0].astype(jnp.float32)
        s0 = jnp.sum(q.astype(jnp.float32) * nk, axis=-1, keepdims=True) * scale
        m_sc[...] = s0                                  # (h, tq, 1)
        l_sc[...] = jnp.full_like(l_sc, 1.0)
        acc_sc[...] = jnp.broadcast_to(nv, acc_sc.shape)

    # scores: contraction on dh, no explicit transpose of K
    s = jnp.einsum('hqd,hkd->hqk', q, k_ref[0],
                   preferred_element_type=jnp.float32) * scale   # (h, tq, tk)
    m_prev = m_sc[...]
    m_new = jnp.maximum(m_prev, s.max(axis=-1, keepdims=True))
    alpha = jnp.exp(m_prev - m_new)
    p = jnp.exp(s - m_new)
    l_sc[...] = alpha * l_sc[...] + p.sum(axis=-1, keepdims=True)
    acc_sc[...] = alpha * acc_sc[...] + jnp.einsum(
        'hqk,hkd->hqd', p.astype(v_ref.dtype), v_ref[0],
        preferred_element_type=jnp.float32)
    m_sc[...] = m_new

    @pl.when(ki == pl.num_programs(3) - 1)
    def _finalize():
        l = l_sc[...]
        r = pl.reciprocal(l, approx=True)               # EUP
        inv_l = r * (2.0 - l * r)                       # one Newton step -> ~f32 exact
        attn = acc_sc[...] * inv_l                      # (h, tq, dh) f32
        tq = attn.shape[1]
        d_model = wo_ref.shape[-1]
        # fused to_out projection: sum over heads of attn[h] @ W_out[h]
        out = jnp.zeros((tq, d_model), jnp.float32)
        for hi in range(heads):
            out = out + jnp.dot(attn[hi].astype(wo_ref.dtype), wo_ref[0, hi],
                                preferred_element_type=jnp.float32)
        o_ref[0, 0] = out.astype(o_ref.dtype)


def flash_attention_out(q_hm, kv_hm, null_k, null_v, w_out_r, *,
                        groups, heads, dim_head, d_model,
                        q_tile=None, kv_tile=None):
    """q_hm: (b, g*h, n, dh), kv_hm: (b, 2*g*h, n, dh) -> (b, g, n, d_model)."""
    b = q_hm.shape[0]
    n = q_hm.shape[2]
    g, h, dh = groups, heads, dim_head
    tq = q_tile or _pick_tile(n, (256, 128))
    tk = kv_tile or _pick_tile(n, (256, 128))
    assert n % tq == 0 and n % tk == 0
    scale = dh ** -0.5
    kernel = functools.partial(_flash_attn_kernel, scale=scale, heads=h)
    return pl.pallas_call(
        kernel,
        out_shape=jax.ShapeDtypeStruct((b, g, n, d_model), q_hm.dtype),
        grid=(b, g, n // tq, n // tk),
        in_specs=[
            pl.BlockSpec((1, h, tq, dh), lambda ib, jg, qi, ki: (ib, jg, qi, 0)),
            # K for output group g_out lives in kv row-block g_out,
            # V for output group g_out lives in kv row-block g + g_out
            # (this IS torch.chunk(2, dim=1) on the flattened grouped channels).
            pl.BlockSpec((1, h, tk, dh), lambda ib, jg, qi, ki: (ib, jg, ki, 0)),
            pl.BlockSpec((1, h, tk, dh), lambda ib, jg, qi, ki: (ib, g + jg, ki, 0)),
            pl.BlockSpec((1, h, 1, dh), lambda ib, jg, qi, ki: (jg, 0, 0, 0)),
            pl.BlockSpec((1, h, 1, dh), lambda ib, jg, qi, ki: (jg, 0, 0, 0)),
            pl.BlockSpec((1, h, dh, d_model), lambda ib, jg, qi, ki: (jg, 0, 0, 0)),
        ],
        out_specs=pl.BlockSpec((1, 1, tq, d_model),
                               lambda ib, jg, qi, ki: (ib, jg, qi, 0)),
        scratch_shapes=[
            pltpu.VMEM((h, tq, 1), jnp.float32),    # running max
            pltpu.VMEM((h, tq, 1), jnp.float32),    # running denom
            pltpu.VMEM((h, tq, dh), jnp.float32),   # accumulator
        ],
        compiler_params=pltpu.CompilerParams(
            dimension_semantics=("parallel", "parallel", "parallel", "arbitrary"),
            vmem_limit_bytes=48 * 1024 * 1024),
    )(q_hm, kv_hm, kv_hm, null_k, null_v, w_out_r)


# ---------------------------------------------------------------------------
# Forward pass
# ---------------------------------------------------------------------------

def attention_forward(x, params, *, heads, groups, dim_head,
                      use_pallas=True, q_tile=None, kv_tile=None, seq_tile=None):
    # TODO(synk): optional paths (context, mask, rotary_emb, q/k/v/output
    # scales, prenorm RMSNorm, dropout, causal, flash-attend flag) are
    # default-off in the module and are not implemented here.
    b, g, n, d = x.shape
    assert g == groups
    h, dh = heads, dim_head
    di = h * dh

    if not use_pallas:
        return _reference_forward(x, params, heads=h, groups=g, dim_head=dh)

    # Kernel-layout weights (weight-sized work only; no activation transposes).
    w_q = params["w_q"]        # (g, di, d)
    w_kv = params["w_kv"]      # (g, 2*di, d)
    w_out = params["w_out"]    # (g, d, di)
    w_all = jnp.concatenate([
        jnp.swapaxes(w_q, 1, 2),                      # (g, d, di)
        jnp.swapaxes(w_kv[:, :di, :], 1, 2),          # (g, d, di)  kv half 0
        jnp.swapaxes(w_kv[:, di:, :], 1, 2),          # (g, d, di)  kv half 1
    ], axis=-1)                                       # (g, d, 3*di)
    w_out_r = jnp.transpose(w_out.reshape(g, d, h, dh), (0, 2, 3, 1))  # (g, h, dh, d)
    null_k = params["null_kv"][0]                     # (g, h, 1, dh)
    null_v = params["null_kv"][1]

    q_hm, kv_hm = qkv_projection(x, w_all, heads=h, dim_head=dh, seq_tile=seq_tile)
    out = flash_attention_out(q_hm, kv_hm, null_k, null_v, w_out_r,
                              groups=g, heads=h, dim_head=dh, d_model=d,
                              q_tile=q_tile, kv_tile=kv_tile)
    return out                                        # (b, g, n, d)


# ---------------------------------------------------------------------------
# Pure-jnp reference (mirrors the torch module exactly, incl. chunk quirk)
# ---------------------------------------------------------------------------

def _reference_forward(x, params, *, heads, groups, dim_head):
    b, g, n, d = x.shape
    h, dh = heads, dim_head
    di = h * dh
    conv = lambda t, w: jnp.einsum("god,bgdn->bgon", w, t)
    x_ch = jnp.swapaxes(x, -1, -2)
    q = conv(x_ch, params["w_q"])
    kv = conv(x_ch, params["w_kv"])
    kv_flat = kv.reshape(b, g * 2 * di, n)
    k_flat = kv_flat[:, : g * di]
    v_flat = kv_flat[:, g * di:]
    q_flat = q.reshape(b, g * di, n)

    def to_bghnd(t):
        return t.reshape(b, g, h, dh, n).transpose(0, 1, 2, 4, 3)

    q_, k_, v_ = map(to_bghnd, (q_flat, k_flat, v_flat))
    q_ = q_.reshape(b * g, h, n, dh)
    k_ = k_.reshape(b * g, h, n, dh)
    v_ = v_.reshape(b * g, h, n, dh)
    nk = jnp.broadcast_to(params["null_kv"][0][None], (b, g, h, 1, dh)).reshape(b * g, h, 1, dh)
    nv = jnp.broadcast_to(params["null_kv"][1][None], (b, g, h, 1, dh)).reshape(b * g, h, 1, dh)
    k_ = jnp.concatenate([nk, k_], axis=-2)
    v_ = jnp.concatenate([nv, v_], axis=-2)
    s = jnp.einsum("bhid,bhjd->bhij", q_, k_) * (dh ** -0.5)
    p = jax.nn.softmax(s, axis=-1)
    out = jnp.einsum("bhij,bhjd->bhid", p, v_)
    out = out.reshape(b, g, h, n, dh).transpose(0, 1, 2, 4, 3).reshape(b, g, di, n)
    out = conv(out, params["w_out"])
    return jnp.swapaxes(out, -1, -2)


# ---------------------------------------------------------------------------
# Deterministic parameter init (shapes from Attention.__init__)
# ---------------------------------------------------------------------------

def init_params(key, dim, dim_head, heads, groups):
    dim_inner = dim_head * heads
    k1, k2, k3, k4 = jax.random.split(key, 4)
    return {
        "w_q": 0.05 * jax.random.normal(k1, (groups, dim_inner, dim), jnp.float32),
        "w_kv": 0.05 * jax.random.normal(k2, (groups, 2 * dim_inner, dim), jnp.float32),
        "w_out": 0.05 * jax.random.normal(k3, (groups, dim, dim_inner), jnp.float32),
        "null_kv": jax.random.normal(k4, (2, groups, heads, 1, dim_head), jnp.float32),
    }


if __name__ == "__main__":
    b, g, n, d = 2, 2, 16, 32
    heads, dim_head = 4, 16

    key = jax.random.PRNGKey(0)
    kx, kp = jax.random.split(key)
    x = jax.random.normal(kx, (b, g, n, d), jnp.float32)
    params = init_params(kp, d, dim_head, heads, g)

    # q_tile/kv_tile=8 so the online-softmax runs over multiple KV tiles even
    # at these toy shapes (exercises init / update / finalize paths).
    out = attention_forward(x, params, heads=heads, groups=g, dim_head=dim_head,
                            use_pallas=True, q_tile=8, kv_tile=8)
    out = jax.block_until_ready(out)

    ref = _reference_forward(x, params, heads=heads, groups=g, dim_head=dim_head)
    assert out.shape == (b, g, n, d)
    assert jnp.allclose(out, ref, atol=2e-4, rtol=2e-3), "mismatch vs jnp reference"

    print("KERNEL_OK")
</pallas_src>

<mosaic_0001>
module attributes {stable_mosaic.version = 11 : i64} {
  func.func @_qkv_proj_kernel(%arg0: i32, %arg1: i32, %arg2: i32, %arg3: memref<1x1x16x32xf32, #tpu.memory_space<vmem>>, %arg4: memref<1x32x192xf32, #tpu.memory_space<vmem>>, %arg5: memref<1x4x16x16xf32, #tpu.memory_space<vmem>>, %arg6: memref<1x8x16x16xf32, #tpu.memory_space<vmem>>) attributes {dimension_semantics = [#tpu.dimension_semantics<parallel>, #tpu.dimension_semantics<parallel>, #tpu.dimension_semantics<parallel>], iteration_bounds = array<i64: 2, 2, 1>, scalar_prefetch = 0 : i64, scratch_operands = 0 : i64, tpu.core_type = #tpu.core_type<tc>, window_params = [{transform_indices = @transform_0, window_bounds = array<i64: 1, 1, 16, 32>}, {transform_indices = @transform_1, window_bounds = array<i64: 1, 32, 192>}, {transform_indices = @transform_2, window_bounds = array<i64: 1, 4, 16, 16>}, {transform_indices = @transform_3, window_bounds = array<i64: 1, 8, 16, 16>}]} {
    %c0 = arith.constant 0 : index
    %c0_0 = arith.constant 0 : index
    %c0_1 = arith.constant 0 : index
    %c0_2 = arith.constant 0 : index
    %0 = vector.load %arg3[%c0, %c0_0, %c0_1, %c0_2] : memref<1x1x16x32xf32, #tpu.memory_space<vmem>>, vector<1x1x16x32xf32>
    %1 = vector.shape_cast %0 : vector<1x1x16x32xf32> to vector<16x32xf32>
    %c0_3 = arith.constant 0 : index
    %c0_4 = arith.constant 0 : index
    %c0_5 = arith.constant 0 : index
    %2 = vector.load %arg4[%c0_3, %c0_4, %c0_5] : memref<1x32x192xf32, #tpu.memory_space<vmem>>, vector<1x32x192xf32>
    %3 = vector.shape_cast %2 : vector<1x32x192xf32> to vector<32x192xf32>
    %cst = arith.constant dense<0.000000e+00> : vector<16x192xf32>
    %4 = tpu.matmul %1, %3, %cst {dimension_numbers = #tpu.dot_dimension_numbers<[1], [0], [0], [1], [0, 0, 1, 1], [], []>} : vector<16x32xf32>, vector<32x192xf32>, vector<16x192xf32> -> vector<16x192xf32>
    %5 = vector.extract_strided_slice %4 {offsets = [0, 0], sizes = [16, 16], strides = [1, 1]} : vector<16x192xf32> to vector<16x16xf32>
    %c0_6 = arith.constant 0 : index
    %c0_7 = arith.constant 0 : index
    %c0_8 = arith.constant 0 : index
    %c0_9 = arith.constant 0 : index
    %6 = vector.load %arg5[%c0_6, %c0_7, %c0_8, %c0_9] : memref<1x4x16x16xf32, #tpu.memory_space<vmem>>, vector<1x1x16x16xf32>
    %7 = vector.shape_cast %6 : vector<1x1x16x16xf32> to vector<16x16xf32>
    %8 = vector.shape_cast %5 : vector<16x16xf32> to vector<1x1x16x16xf32>
    tpu.vector_store %arg5[%c0_6, %c0_7, %c0_8, %c0_9], %8 {strides = array<i32>} : memref<1x4x16x16xf32, #tpu.memory_space<vmem>>, vector<1x1x16x16xf32>,
    %9 = vector.extract_strided_slice %4 {offsets = [0, 64], sizes = [16, 16], strides = [1, 1]} : vector<16x192xf32> to vector<16x16xf32>
    %c0_10 = arith.constant 0 : index
    %c0_11 = arith.constant 0 : index
    %c0_12 = arith.constant 0 : index
    %c0_13 = arith.constant 0 : index
    %10 = vector.load %arg6[%c0_10, %c0_11, %c0_12, %c0_13] : memref<1x8x16x16xf32, #tpu.memory_space<vmem>>, vector<1x1x16x16xf32>
    %11 = vector.shape_cast %10 : vector<1x1x16x16xf32> to vector<16x16xf32>
    %12 = vector.shape_cast %9 : vector<16x16xf32> to vector<1x1x16x16xf32>
    tpu.vector_store %arg6[%c0_10, %c0_11, %c0_12, %c0_13], %12 {strides = array<i32>} : memref<1x8x16x16xf32, #tpu.memory_space<vmem>>, vector<1x1x16x16xf32>,
    %13 = vector.extract_strided_slice %4 {offsets = [0, 128], sizes = [16, 16], strides = [1, 1]} : vector<16x192xf32> to vector<16x16xf32>
    %c0_14 = arith.constant 0 : index
    %c4 = arith.constant 4 : index
    %c0_15 = arith.constant 0 : index
    %c0_16 = arith.constant 0 : index
    %14 = vector.load %arg6[%c0_14, %c4, %c0_15, %c0_16] : memref<1x8x16x16xf32, #tpu.memory_space<vmem>>, vector<1x1x16x16xf32>
    %15 = vector.shape_cast %14 : vector<1x1x16x16xf32> to vector<16x16xf32>
    %16 = vector.shape_cast %13 : vector<16x16xf32> to vector<1x1x16x16xf32>
    tpu.vector_store %arg6[%c0_14, %c4, %c0_15, %c0_16], %16 {strides = array<i32>} : memref<1x8x16x16xf32, #tpu.memory_space<vmem>>, vector<1x1x16x16xf32>,
    %17 = vector.extract_strided_slice %4 {offsets = [0, 16], sizes = [16, 16], strides = [1, 1]} : vector<16x192xf32> to vector<16x16xf32>
    %c0_17 = arith.constant 0 : index
    %c1 = arith.constant 1 : index
    %c0_18 = arith.constant 0 : index
    %c0_19 = arith.constant 0 : index
    %18 = vector.load %arg5[%c0_17, %c1, %c0_18, %c0_19] : memref<1x4x16x16xf32, #tpu.memory_space<vmem>>, vector<1x1x16x16xf32>
    %19 = vector.shape_cast %18 : vector<1x1x16x16xf32> to vector<16x16xf32>
    %20 = vector.shape_cast %17 : vector<16x16xf32> to vector<1x1x16x16xf32>
    tpu.vector_store %arg5[%c0_17, %c1, %c0_18, %c0_19], %20 {strides = array<i32>} : memref<1x4x16x16xf32, #tpu.memory_space<vmem>>, vector<1x1x16x16xf32>,
    %21 = vector.extract_strided_slice %4 {offsets = [0, 80], sizes = [16, 16], strides = [1, 1]} : vector<16x192xf32> to vector<16x16xf32>
    %c0_20 = arith.constant 0 : index
    %c1_21 = arith.constant 1 : index
    %c0_22 = arith.constant 0 : index
    %c0_23 = arith.constant 0 : index
    %22 = vector.load %arg6[%c0_20, %c1_21, %c0_22, %c0_23] : memref<1x8x16x16xf32, #tpu.memory_space<vmem>>, vector<1x1x16x16xf32>
    %23 = vector.shape_cast %22 : vector<1x1x16x16xf32> to vector<16x16xf32>
    %24 = vector.shape_cast %21 : vector<16x16xf32> to vector<1x1x16x16xf32>
    tpu.vector_store %arg6[%c0_20, %c1_21, %c0_22, %c0_23], %24 {strides = array<i32>} : memref<1x8x16x16xf32, #tpu.memory_space<vmem>>, vector<1x1x16x16xf32>,
    %25 = vector.extract_strided_slice %4 {offsets = [0, 144], sizes = [16, 16], strides = [1, 1]} : vector<16x192xf32> to vector<16x16xf32>
    %c0_24 = arith.constant 0 : index
    %c5 = arith.constant 5 : index
    %c0_25 = arith.constant 0 : index
    %c0_26 = arith.constant 0 : index
    %26 = vector.load %arg6[%c0_24, %c5, %c0_25, %c0_26] : memref<1x8x16x16xf32, #tpu.memory_space<vmem>>, vector<1x1x16x16xf32>
    %27 = vector.shape_cast %26 : vector<1x1x16x16xf32> to vector<16x16xf32>
    %28 = vector.shape_cast %25 : vector<16x16xf32> to vector<1x1x16x16xf32>
    tpu.vector_store %arg6[%c0_24, %c5, %c0_25, %c0_26], %28 {strides = array<i32>} : memref<1x8x16x16xf32, #tpu.memory_space<vmem>>, vector<1x1x16x16xf32>,
    %29 = vector.extract_strided_slice %4 {offsets = [0, 32], sizes = [16, 16], strides = [1, 1]} : vector<16x192xf32> to vector<16x16xf32>
    %c0_27 = arith.constant 0 : index
    %c2 = arith.constant 2 : index
    %c0_28 = arith.constant 0 : index
    %c0_29 = arith.constant 0 : index
    %30 = vector.load %arg5[%c0_27, %c2, %c0_28, %c0_29] : memref<1x4x16x16xf32, #tpu.memory_space<vmem>>, vector<1x1x16x16xf32>
    %31 = vector.shape_cast %30 : vector<1x1x16x16xf32> to vector<16x16xf32>
    %32 = vector.shape_cast %29 : vector<16x16xf32> to vector<1x1x16x16xf32>
    tpu.vector_store %arg5[%c0_27, %c2, %c0_28, %c0_29], %32 {strides = array<i32>} : memref<1x4x16x16xf32, #tpu.memory_space<vmem>>, vector<1x1x16x16xf32>,
    %33 = vector.extract_strided_slice %4 {offsets = [0, 96], sizes = [16, 16], strides = [1, 1]} : vector<16x192xf32> to vector<16x16xf32>
    %c0_30 = arith.constant 0 : index
    %c2_31 = arith.constant 2 : index
    %c0_32 = arith.constant 0 : index
    %c0_33 = arith.constant 0 : index
    %34 = vector.load %arg6[%c0_30, %c2_31, %c0_32, %c0_33] : memref<1x8x16x16xf32, #tpu.memory_space<vmem>>, vector<1x1x16x16xf32>
    %35 = vector.shape_cast %34 : vector<1x1x16x16xf32> to vector<16x16xf32>
    %36 = vector.shape_cast %33 : vector<16x16xf32> to vector<1x1x16x16xf32>
    tpu.vector_store %arg6[%c0_30, %c2_31, %c0_32, %c0_33], %36 {strides = array<i32>} : memref<1x8x16x16xf32, #tpu.memory_space<vmem>>, vector<1x1x16x16xf32>,
    %37 = vector.extract_strided_slice %4 {offsets = [0, 160], sizes = [16, 16], strides = [1, 1]} : vector<16x192xf32> to vector<16x16xf32>
    %c0_34 = arith.constant 0 : index
    %c6 = arith.constant 6 : index
    %c0_35 = arith.constant 0 : index
    %c0_36 = arith.constant 0 : index
    %38 = vector.load %arg6[%c0_34, %c6, %c0_35, %c0_36] : memref<1x8x16x16xf32, #tpu.memory_space<vmem>>, vector<1x1x16x16xf32>
    %39 = vector.shape_cast %38 : vector<1x1x16x16xf32> to vector<16x16xf32>
    %40 = vector.shape_cast %37 : vector<16x16xf32> to vector<1x1x16x16xf32>
    tpu.vector_store %arg6[%c0_34, %c6, %c0_35, %c0_36], %40 {strides = array<i32>} : memref<1x8x16x16xf32, #tpu.memory_space<vmem>>, vector<1x1x16x16xf32>,
    %41 = vector.extract_strided_slice %4 {offsets = [0, 48], sizes = [16, 16], strides = [1, 1]} : vector<16x192xf32> to vector<16x16xf32>
    %c0_37 = arith.constant 0 : index
    %c3 = arith.constant 3 : index
    %c0_38 = arith.constant 0 : index
    %c0_39 = arith.constant 0 : index
    %42 = vector.load %arg5[%c0_37, %c3, %c0_38, %c0_39] : memref<1x4x16x16xf32, #tpu.memory_space<vmem>>, vector<1x1x16x16xf32>
    %43 = vector.shape_cast %42 : vector<1x1x16x16xf32> to vector<16x16xf32>
    %44 = vector.shape_cast %41 : vector<16x16xf32> to vector<1x1x16x16xf32>
    tpu.vector_store %arg5[%c0_37, %c3, %c0_38, %c0_39], %44 {strides = array<i32>} : memref<1x4x16x16xf32, #tpu.memory_space<vmem>>, vector<1x1x16x16xf32>,
    %45 = vector.extract_strided_slice %4 {offsets = [0, 112], sizes = [16, 16], strides = [1, 1]} : vector<16x192xf32> to vector<16x16xf32>
    %c0_40 = arith.constant 0 : index
    %c3_41 = arith.constant 3 : index
    %c0_42 = arith.constant 0 : index
    %c0_43 = arith.constant 0 : index
    %46 = vector.load %arg6[%c0_40, %c3_41, %c0_42, %c0_43] : memref<1x8x16x16xf32, #tpu.memory_space<vmem>>, vector<1x1x16x16xf32>
    %47 = vector.shape_cast %46 : vector<1x1x16x16xf32> to vector<16x16xf32>
    %48 = vector.shape_cast %45 : vector<16x16xf32> to vector<1x1x16x16xf32>
    tpu.vector_store %arg6[%c0_40, %c3_41, %c0_42, %c0_43], %48 {strides = array<i32>} : memref<1x8x16x16xf32, #tpu.memory_space<vmem>>, vector<1x1x16x16xf32>,
    %49 = vector.extract_strided_slice %4 {offsets = [0, 176], sizes = [16, 16], strides = [1, 1]} : vector<16x192xf32> to vector<16x16xf32>
    %c0_44 = arith.constant 0 : index
    %c7 = arith.constant 7 : index
    %c0_45 = arith.constant 0 : index
    %c0_46 = arith.constant 0 : index
    %50 = vector.load %arg6[%c0_44, %c7, %c0_45, %c0_46] : memref<1x8x16x16xf32, #tpu.memory_space<vmem>>, vector<1x1x16x16xf32>
    %51 = vector.shape_cast %50 : vector<1x1x16x16xf32> to vector<16x16xf32>
    %52 = vector.shape_cast %49 : vector<16x16xf32> to vector<1x1x16x16xf32>
    tpu.vector_store %arg6[%c0_44, %c7, %c0_45, %c0_46], %52 {strides = array<i32>} : memref<1x8x16x16xf32, #tpu.memory_space<vmem>>, vector<1x1x16x16xf32>,
    return
  }
  func.func @transform_0(%arg0: i32, %arg1: i32, %arg2: i32) -> (i32, i32, i32, i32) {
    %c0_i32 = arith.constant 0 : i32
    %c0_i32_0 = arith.constant 0 : i32
    return %arg1, %arg0, %arg2, %c0_i32 : i32, i32, i32, i32
  }
  func.func @transform_1(%arg0: i32, %arg1: i32, %arg2: i32) -> (i32, i32, i32) {
    %c0_i32 = arith.constant 0 : i32
    %c0_i32_0 = arith.constant 0 : i32
    %c0_i32_1 = arith.constant 0 : i32
    return %arg0, %c0_i32, %c0_i32_0 : i32, i32, i32
  }
  func.func @transform_2(%arg0: i32, %arg1: i32, %arg2: i32) -> (i32, i32, i32, i32) {
    %c0_i32 = arith.constant 0 : i32
    %c0_i32_0 = arith.constant 0 : i32
    return %arg1, %arg0, %arg2, %c0_i32 : i32, i32, i32, i32
  }
  func.func @transform_3(%arg0: i32, %arg1: i32, %arg2: i32) -> (i32, i32, i32, i32) {
    %c0_i32 = arith.constant 0 : i32
    %c0_i32_0 = arith.constant 0 : i32
    return %arg1, %arg0, %arg2, %c0_i32 : i32, i32, i32, i32
  }
}

</mosaic_0001>

<bundles_post_ra>
// kernel: tpu_custom_call.1
= control target key start
LH: loop header
LB: loop body
LE: loop exit
PB: predicated region body
PF: predicated region fallthrough
CT: control target
= control target key end

     0   :  { %s1381_s0 = inlined_call_operand.hbm [shape: f32[2,2,16,32], index: 0, kind: input, shape index: {}]   ;;  %s1382_s1 = inlined_call_operand.hbm [shape: f32[2,32,192], index: 1, kind: input, shape index: {}]   ;;  %s1383_s2 = inlined_call_operand.hbm [shape: f32[2,8,16,16], index: 2, kind: output, shape index: {0}]   ;;  %s1384_s3 = inlined_call_operand.hbm [shape: f32[2,16,16,16], index: 3, kind: output, shape index: {1}]  }
   0x1   :  { %1390 = sst [smem:[#allocation18_spill]] %s1381_s0 }
   0x2   :  { %9 = vsyncpa [#allocation3], 0 }
   0x3   :  { %11 = vsyncpa [#allocation3 + $0x1], 0 }
   0x4   :  { %12 = vsyncpa [#allocation6], 0 }
   0x5   :  { %14 = vsyncpa [#allocation6 + $0x1], 0 }
   0x6   :  { %15 = vsyncpa [#allocation4], 0 }
   0x7   :  { %17 = vsyncpa [#allocation4 + $0x1], 0 }
   0x8   :  { %18 = vsyncpa [#allocation9], 0 }
   0x9   :  { %20 = vsyncpa [#allocation9 + $0x1], 0  ;;  %s1093_s12 = smov 0   ;;  %s1095_s13 = smov 0  }
   0xa   :  { %s1097_s14 = smov 0   ;;  %s1099_s15 = smov 0  }
   0xb   :  { %s1101_s16 = smov 0   ;;  %s1103_s17 = smov 0  }
   0xc   :  { %s1105_s18 = smov 0   ;;  %s1107_s19 = smov 0  }
   0xd   :  { %s1109_s20 = smov 0   ;;  %s1111_s21 = smov 0  }
   0xe   :  { %s1113_s22 = smov 0  }
   0xf LB: > { %1391 = sst [smem:[#allocation14_spill]] %s1030_s15  ;;  %s652_s23 = sadd.s32 4294967295, %s1058_s22   ;;  %s1058_s22 = sphi %s1113_s22, %s26_s22   ;;  %s1054_s21 = sphi %s1111_s21, %s1417_s21   ;;  %s1050_s20 = sphi %s1109_s20, %s1416_s20   ;;  %s1046_s19 = sphi %s1107_s19, %s1415_s19   ;;  %s1042_s18 = sphi %s1105_s18, %s1414_s18   ;;  %s1038_s17 = sphi %s1103_s17, %s1413_s17   ;;  %s1034_s16 = sphi %s1101_s16, %s1412_s16   ;;  %s1030_s15 = sphi %s1099_s15, %s1411_s15   ;;  %s1026_s14 = sphi %s1097_s14, %s1410_s14   ;;  %s1022_s13 = sphi %s1095_s13, %s1409_s13   ;;  %s1018_s12 = sphi %s1093_s12, %s1408_s12  }
  0x10   : > { %s653_s24 = sadd.s32 4294967294, %s1058_s22   ;;  %s41_s25 = sadd.s32 1, %s1050_s20 }
  0x11   : > { %s45_s26 = sadd.s32 1, %s1054_s21  ;;  %p43_p0 = scmp.ge.s32.totalorder %s41_s25, 2 }
  0x12   : > { %s56_s27 = sadd.s32 1, %s1038_s17  ;;  %p63_p1 = scmp.ne.s32.totalorder %s1038_s17, %s1034_s16 }
  0x13   : > { %p64_p2 = scmp.eq.s32.totalorder %s1058_s22, 0  ;;  %s1419_s25 = smov (%p43_p0, %s41_s25), 0 }
  0x14   : > { %1392 = sst [smem:[#allocation15_spill]] %s1419_s25  ;;  %s1421_s26 = smov (!%p43_p0, %s45_s26), %s1054_s21 }
  0x15   : > { %s49_s28 = ssub.s32 %s1050_s20, %s1419_s25  ;;  %p1163_p3 = por %p64_p2, %p63_p1 }
  0x16   : > { %p47_p4 = scmp.ge.s32.totalorder %s1421_s26, 2  ;;  %p69_p5 = scmp.ne.s32.totalorder %s1034_s16, %s1030_s15 }
  0x17   : > { %p1169_p6 = scmp.eq.s32.totalorder %s652_s23, 0  ;;  %p123_p7 = scmp.eq.s32.totalorder %s652_s23, 3 }
  0x18   : > { %s1423_s26 = smov (%p47_p4, %s1421_s26), 0  ;;  %p129_p10 = scmp.eq.s32.totalorder %s653_s24, 3 }
  0x19   : > { %1395 = sst [smem:[#allocation16_spill]] %s1423_s26  ;;  %p1177_p8 = por %p1169_p6, %p69_p5 }
  0x1a   : > { %p1181_p9 = por %p123_p7, %p63_p1  ;;  %s1187_s6 = ssub.s32 %s1054_s21, %s1423_s26 }
  0x1b   : > { %s51_s7 = sor.u32 %s1187_s6, %s49_s28  ;;  %p80_p11 = scmp.eq.s32.totalorder %s1187_s6, 0 }
  0x1c   : > { %p54_p12 = scmp.eq.s32.totalorder %s51_s7, 0  ;;  %p1191_p13 = por %p129_p10, %p69_p5 }
  0x1d   : > { %p1389_p0 = scmp.lt.s32.totalorder %s1058_s22, 4  ;;  %s179_s10 = sand.u32 1, %s1038_s17  }
  0x1e   : > { %s1398_s8 = scalar_select %p1191_p13, 1, 0 }
  0x1f   : > { %s1197_s9 = scalar_select %p54_p12, %s1038_s17, %s56_s27  }
  0x20   : > { %1399 = sst [smem:[#allocation17_spill]] %s1398_s8  ;;  %s657_s11 = sshll.u32 %s1054_s21, 1 }
  0x21   : > { %s656_s23 = sshll.u32 %s179_s10, 4  ;;  %s658_s26 = sshll.u32 %s1050_s20, 2 }
  0x22   : > { %s190_s25 = sadd.s32 %s658_s26, %s657_s11  ;;  %s183_s24 = scalar_lea.vmem [#allocation2], %s656_s23 }
  0x23   : > { %s195_s28 = sshll.u32 %s183_s24, 4  ;;  %s659_s7 = sshll.u32 %s190_s25, 3  ;;  %s196_s28 = int_to_ptr.vmem [resolvable:$true] %s195_s28 }
  0x24   : > { %s1400_s0 = sld [smem:[#allocation18_spill]]  ;;  %p724_p1 = pnand %p1389_p0, %p1163_p3 }
  0x25   : > { %p663_p4 = scmp.ge.s32.totalorder %s1058_s22, 1  ;;  %s180_s11 = scalar_lea.sflag [#allocation3], %s179_s10 }
  0x26   : > { %s1060_s23 = smov 128   ;;  %s1061_s25 = smov 8  }
  0x27   : > { %p225_p5 = scmp.lt.s32.totalorder %s1058_s22, 5  ;;  %s82_s15 = sadd.s32 1, %s1026_s14 }
  0x28   : > { %p89_p10 = scmp.ne.s32.totalorder %s1026_s14, %s1022_s13  ;;  %p95_p12 = scmp.ne.s32.totalorder %s1022_s13, %s1018_s12 }
  0x29   : > { %p1211_p7 = pnand %p663_p4, %p225_p5  ;;  %s205_s8 = sand.u32 1, %s1026_s14  }
  0x2a   : > { %s192_s27 = scalar_lea.hbm %s1400_s0, %s659_s7  ;;  %p91_p3 = por %p89_p10, %p64_p2 }
  0x2b   : > { %s193_s26 = sshll.u32 %s192_s27, 4  ;;  %s704_s7 = sshll.u32 %s1054_s21, 6  ;;  %s194_s26 = int_to_ptr.hbm [resolvable:$true] %s193_s26 }
  0x2c   : > { %726 = dma.hbm_to_vmem [thread:$0]  (!%p724_p1), %s194_s26, 256, %s196_s28, %s180_s11, %s1060_s23, %s1060_s23, %s1061_s25  }
  0x2d   : > { %s1221_s29 = scalar_select %p80_p11, %s1026_s14, %s82_s15  }
  0x2e   : > { %p1231_p0 = por %p95_p12, %p1169_p6  ;;  %s660_s28 = sshll.u32 %s205_s8, 6 }
  0x2f   : > { %s214_s11 = scalar_lea.hbm %s1382_s1, %s704_s7  ;;  %s209_s6 = scalar_lea.vmem [#allocation5], %s660_s28 }
  0x30   : > { %s215_s23 = sshll.u32 %s214_s11, 4  ;;  %s217_s25 = sshll.u32 %s209_s6, 4  ;;  %s216_s23 = int_to_ptr.hbm [resolvable:$true] %s215_s23  ;;  %s218_s25 = int_to_ptr.vmem [resolvable:$true] %s217_s25 }
  0x31   : > { %p1403_p11 = scmp.lt.s32.totalorder %s1058_s22, 4  ;;  %s206_s12 = scalar_lea.sflag [#allocation6], %s205_s8 }
  0x32   : > { %s1062_s15 = smov 256   ;;  %s1063_s0 = smov 16  }
  0x33   : > { %p727_p2 = pnand %p1403_p11, %p91_p3  ;;  %229 = sbr.rel (%p1211_p7) target bundleno = 368 (0x170), region = 28 }
  0x34   : > { %s1243_s30 = sand.u32 (!%p1211_p7), 1, %s1034_s16  }
  0x35   : > { %729 = dma.hbm_to_vmem [thread:$0]  (!%p727_p2), %s216_s23, 1024, %s218_s25, %s206_s12, %s1062_s15, %s1062_s15, %s1063_s0  }
  0x36   : > { %s664_s7 = sshll.u32 (!%p1211_p7), %s1243_s30, 4  ;;  %s232_s27 = scalar_lea.sflag (!%p1211_p7), [#allocation3], %s1243_s30 }
  0x37   : > { %s235_s28 = scalar_lea.vmem (!%p1211_p7), [#allocation2], %s664_s7 }
  0x38   : > { %1001 = dma.done.wait (%p1177_p8), %s232_s27, 256  }
  0x39   : > { %1003 = vsyncadd (%p1177_p8), %s232_s27, 4294967040  ;;  %s241_s0 = sand.u32 1, %s1022_s13  }
  0x3a   : > { %s665_s8 = sshll.u32 %s241_s0, 6  ;;  %s242_s24 = scalar_lea.sflag [#allocation6], %s241_s0 }
  0x3b   : > { %s245_s26 = scalar_lea.vmem [#allocation5], %s665_s8 }
  0x3c   : > { %1005 = dma.done.wait (%p1231_p0), %s242_s24, 1024  }
  0x3d   : > { %1007 = vsyncadd (%p1231_p0), %s242_s24, 4294966272  ;;  %v292_v0 = vld [vmem:[%s245_s26 + $0x30] sm:$0xff]  ;;  %v290_v1 = vld [vmem:[%s245_s26 + $0x20] sm:$0xff]  ;;  %vm294_vm0 = vcmask 261120   ;;  %s666_s4 = sshll.u32 %s1243_s30, 6  ;;  %s667_s10 = sshll.u32 %s1243_s30, 7 }
  0x3e   : > { %313 = vmatpush.msra.mxu0 %v292_v0  ;;  %v293_v2 = vld [vmem:[%s245_s26 + $0x38] sm:$0xff]  ;;  %707 = vmatpush.msra.mxu2 %v292_v0  ;;  %v288_v3 = vld [vmem:[%s245_s26 + $0x10] sm:$0xff]  ;;  %v291_v4 = vld [vmem:[%s245_s26 + $0x28] sm:$0xff]  ;;  %vm347_vm1 = vcmask 130048   ;;  %s1258_s11 = scalar_lea.vmem [#allocation7], %s666_s4  ;;  %s1064_s23 = smov 48  }
  0x3f   : > { %336 = vmatpush.msra.mxu1 %v293_v2  ;;  %711 = vmatpush.msra.mxu3 %v293_v2  ;;  %v289_v5 = vld [vmem:[%s245_s26 + $0x18] sm:$0xff]  ;;  %v286_v6 = vld [vmem:[%s245_s26] sm:$0xff]  ;;  %v287_v8 = vld [vmem:[%s245_s26 + $0x8] sm:$0xff]  ;;  %s1065_s6 = smov 112   ;;  %s1066_s25 = smov 64  }
  0x40   : > { %314 = vmatpush.msra.mxu0 %v290_v1  ;;  %708 = vmatpush.msra.mxu2 %v290_v1  ;;  %v284_v7 = vld [vmem:[%s235_s28] sm:$0xff]  ;;  %v285_v9 = vld [vmem:[%s235_s28 + $0x8] sm:$0xff]  ;;  %s1262_s12 = scalar_lea.vmem [#allocation8], %s667_s10  ;;  %s1067_s15 = smov 96  }
  0x41   : > { %337 = vmatpush.msra.mxu1 %v291_v4  ;;  %712 = vmatpush.msra.mxu3 %v291_v4  ;;  %s1068_s7 = smov 32   ;;  %s1069_s27 = smov 80  }
  0x42   : > { %315 = vmatpush.msra.mxu0 %v288_v3  ;;  %709 = vmatpush.msra.mxu2 %v288_v3  ;;  %s1070_s28 = smov 16   ;;  %s705_s0 = sshll.u32 %s1046_s19, 3 }
  0x43   : > { %338 = vmatpush.msra.mxu1 %v289_v5  ;;  %713 = vmatpush.msra.mxu3 %v289_v5  ;;  %s696_s8 = sshll.u32 %s1042_s18, 4  ;;  %s706_s4 = sshll.u32 %s1046_s19, 4 }
  0x44   : > { %316 = vmatpush.msra.mxu0 %v286_v6  ;;  %710 = vmatpush.msra.mxu2 %v286_v6  ;;  %s466_s24 = sadd.s32 %s705_s0, %s696_s8 }
  0x45   : > { %668 = vmatmul.msk.f32.vlgmr.msra.gmra.mxu0 %vm294_vm0, %v284_v7  ;;  %339 = vmatpush.msra.mxu1 %v287_v8  ;;  %s697_s26 = sshll.u32 %s466_s24, 3 }
  0x46   : > { %670 = vmatmul.msk.f32.vlgmr.msra.gmra.mxu1 %vm294_vm0, %v284_v7  ;;  %669 = vmatmul.msk.f32.vlgmr.msra.gmra.mxu2 %vm294_vm0, %v285_v9 }
  0x47   : > { %714 = vmatpush.msra.mxu3 %v287_v8 }
  0x48   : > { %671 = vmatmul.msk.f32.vlgmr.msra.gmra.mxu3 %vm294_vm0, %v285_v9 }
  0xc2   : > { %v318_v10 = vpop.f32.mrf.mxu0 }
  0xc3   : > { %348 = vst.msk [vmem:[%s1258_s11] sm:$0xff] %vm347_vm1, %v318_v10  ;;  %372 = vrot.lane.b32.xlu2 %v318_v10, %s1064_s23  ;;  %363 = vrot.lane.b32.xlu1 %v318_v10, %s1065_s6  ;;  %v341_v11 = vpop.f32.mrf.mxu1 }
  0xc4   : > { %352 = vrot.lane.b32.xlu0 %v318_v10, %s1066_s25  ;;  %672 = vst.msk [vmem:[%s1262_s12 + $0x40] sm:$0xff] %vm347_vm1, %v341_v11 }
  0xc9   : > { %v321_v12 = vpop.f32.mrf.mxu2 }
  0xca   : > { %349 = vst.msk [vmem:[%s1258_s11 + $0x8] sm:$0xff] %vm347_vm1, %v321_v12 }
  0xcb   : > { %392 = vrot.lane.b32.xlu2 %v318_v10, %s1067_s15  ;;  %401 = vrot.lane.b32.xlu1 %v318_v10, %s1068_s7  ;;  %v344_v13 = vpop.f32.mrf.mxu3 }
  0xcc   : > { %383 = vrot.lane.b32.xlu0 %v341_v11, %s1065_s6  ;;  %673 = vst.msk [vmem:[%s1262_s12 + $0x48] sm:$0xff] %vm347_vm1, %v344_v13 }
  0xd3   : > { %419 = vrot.lane.b32.xlu2 %v318_v10, %s1069_s27  ;;  %428 = vrot.lane.b32.xlu1 %v318_v10, %s1070_s28 }
  0xd4   : > { %410 = vrot.lane.b32.xlu0 %v341_v11, %s1067_s15 }
  0xdb   : > { %374 = vrot.lane.b32.xlu2 %v321_v12, %s1064_s23  ;;  %365 = vrot.lane.b32.xlu1 %v321_v12, %s1065_s6  ;;  %s920_s23 = scalar_lea.hbm %s1383_s2, 256 }
  0xdc   : > { %354 = vrot.lane.b32.xlu0 %v321_v12, %s1066_s25  ;;  %s700_s25 = sshll.u32 %s1042_s18, 5  ;;  %s447_s18 = scalar_lea.sflag [#allocation4], %s1243_s30 }
  0xe3   : > { %403 = vrot.lane.b32.xlu2 %v321_v12, %s1068_s7  ;;  %385 = vrot.lane.b32.xlu1 %v344_v13, %s1065_s6  ;;  %s468_s6 = scalar_lea.hbm %s1383_s2, %s697_s26 }
  0xe4   : > { %394 = vrot.lane.b32.xlu0 %v321_v12, %s1067_s15  ;;  %s471_s7 = sshll.u32 %s468_s6, 4  ;;  %s472_s7 = int_to_ptr.hbm [resolvable:$true] %s471_s7 }
  0xe5   : > { %s914_s24 = sshra.s32 %s472_s7, 4  ;;  %s915_s24 = int_to_ptr.hbm [resolvable:$true] %s914_s24 }
  0xe6   : > { %s916_s26 = scalar_lea.hbm %s915_s24, 64  ;;  %p921_p1 = scmp.lt.s32.totalorder %s915_s24, %s1383_s2 }
  0xe7   : > { %p917_p6 = scmp.ne.s32.totalorder %s915_s24, %s916_s26  ;;  %p922_p4 = scmp.lt.s32.totalorder %s920_s23, %s916_s26 }
  0xe9   : > { %p918_p8 = pnand %p917_p6, %p1181_p9  ;;  %p923_p5 = por %p922_p4, %p921_p1 }
  0xeb   : > { %430 = vrot.lane.b32.xlu2 %v321_v12, %s1070_s28  ;;  %412 = vrot.lane.b32.xlu1 %v344_v13, %s1067_s15  ;;  %s469_s15 = sshll.u32 %s1258_s11, 4  ;;  %p919_p0 = pneg %p918_p8  ;;  %s470_s15 = int_to_ptr.vmem [resolvable:$true] %s469_s15 }
  0xec   : > { %421 = vrot.lane.b32.xlu0 %v321_v12, %s1069_s27 }
  0xed   : > { %p924_p7 = pnand %p923_p5, %p919_p0 }
  0xf3   : > { %439 = vrot.lane.b32.xlu1 %v344_v13, %s1069_s27 }
  0xf4   : > { %437 = vrot.lane.b32.xlu0 %v341_v11, %s1069_s27  ;;  %s488_s27 = sadd.s32 %s706_s4, %s700_s25 }
  0xf5   : > { %s701_s28 = sshll.u32 %s488_s27, 3 }
  0xf6   : > { %s490_s8 = scalar_lea.hbm %s1384_s3, %s701_s28 }
 0x11d   : > { %v373_v14 = vpop.permute.xlu2 %372 }
 0x11e   : > { %676 = vst.msk [vmem:[%s1262_s12 + $0x10] sm:$0xff] %vm347_vm1, %v373_v14 }
 0x125   : > { %v393_v15 = vpop.permute.xlu2 %392 }
 0x126   : > { %680 = vst.msk [vmem:[%s1258_s11 + $0x20] sm:$0xff] %vm347_vm1, %v393_v15 }
 0x12d   : > { %v420_v16 = vpop.permute.xlu2 %419 }
 0x12e   : > { %686 = vst.msk [vmem:[%s1258_s11 + $0x30] sm:$0xff] %vm347_vm1, %v420_v16 }
 0x135   : > { %v375_v17 = vpop.permute.xlu2 %374  ;;  %v364_v18 = vpop.permute.xlu1 %363 }
 0x136   : > { %677 = vst.msk [vmem:[%s1262_s12 + $0x18] sm:$0xff] %vm347_vm1, %v375_v17  ;;  %v353_v19 = vpop.permute.xlu0 %352 }
 0x137   : > { %674 = vst.msk [vmem:[%s1258_s11 + $0x10] sm:$0xff] %vm347_vm1, %v364_v18 }
 0x138   : > { %358 = vst.msk [vmem:[%s1262_s12] sm:$0xff] %vm347_vm1, %v353_v19 }
 0x13d   : > { %v404_v20 = vpop.permute.xlu2 %403  ;;  %v402_v21 = vpop.permute.xlu1 %401 }
 0x13e   : > { %683 = vst.msk [vmem:[%s1262_s12 + $0x28] sm:$0xff] %vm347_vm1, %v404_v20  ;;  %v384_v22 = vpop.permute.xlu0 %383 }
 0x13f   : > { %682 = vst.msk [vmem:[%s1262_s12 + $0x20] sm:$0xff] %vm347_vm1, %v402_v21 }
 0x140   : > { %678 = vst.msk [vmem:[%s1262_s12 + $0x50] sm:$0xff] %vm347_vm1, %v384_v22 }
 0x145   : > { %v431_v23 = vpop.permute.xlu2 %430  ;;  %v429_v24 = vpop.permute.xlu1 %428 }
 0x146   : > { %689 = vst.msk [vmem:[%s1262_s12 + $0x38] sm:$0xff] %vm347_vm1, %v431_v23  ;;  %v411_v25 = vpop.permute.xlu0 %410 }
 0x147   : > { %688 = vst.msk [vmem:[%s1262_s12 + $0x30] sm:$0xff] %vm347_vm1, %v429_v24 }
 0x148   : > { %684 = vst.msk [vmem:[%s1262_s12 + $0x60] sm:$0xff] %vm347_vm1, %v411_v25 }
 0x14d   : > { %v366_v26 = vpop.permute.xlu1 %365 }
 0x14e   : > { %675 = vst.msk [vmem:[%s1258_s11 + $0x18] sm:$0xff] %vm347_vm1, %v366_v26  ;;  %v355_v27 = vpop.permute.xlu0 %354 }
 0x14f   : > { %359 = vst.msk [vmem:[%s1262_s12 + $0x8] sm:$0xff] %vm347_vm1, %v355_v27 }
 0x155   : > { %v386_v28 = vpop.permute.xlu1 %385 }
 0x156   : > { %679 = vst.msk [vmem:[%s1262_s12 + $0x58] sm:$0xff] %vm347_vm1, %v386_v28  ;;  %v395_v29 = vpop.permute.xlu0 %394 }
 0x157   : > { %681 = vst.msk [vmem:[%s1258_s11 + $0x28] sm:$0xff] %vm347_vm1, %v395_v29 }
 0x15d   : > { %v413_v30 = vpop.permute.xlu1 %412 }
 0x15e   : > { %685 = vst.msk [vmem:[%s1262_s12 + $0x68] sm:$0xff] %vm347_vm1, %v413_v30  ;;  %v422_v31 = vpop.permute.xlu0 %421 }
 0x15f   : > { %687 = vst.msk [vmem:[%s1258_s11 + $0x38] sm:$0xff] %vm347_vm1, %v422_v31 }
 0x160   : > { %927 = shalt.err (!%p924_p7)
}
 0x161   : > { %s1071_s11 = smov 128   ;;  %s1072_s27 = smov 8  }
 0x162   : > { %719 = dma.vmem_to_hbm [thread:$0]  (%p1181_p9), %s470_s15, 1024, %s472_s7, %s447_s18, %s1071_s11, %s1071_s11, %s1072_s27  }
 0x163   : > { %s491_s28 = sshll.u32 %s1262_s12, 4  ;;  %s493_s19 = sshll.u32 %s490_s8, 4  ;;  %s492_s28 = int_to_ptr.vmem [resolvable:$true] %s491_s28  ;;  %s494_s19 = int_to_ptr.hbm [resolvable:$true] %s493_s19 }
 0x164   : > { %s452_s0 = scalar_lea.sflag [#allocation9], %s1243_s30  ;;  %s942_s24 = sshra.s32 %s494_s19, 4  ;;  %s943_s24 = int_to_ptr.hbm [resolvable:$true] %s942_s24 }
 0x165   : > { %v440_v32 = vpop.permute.xlu1 %439  ;;  %s944_s26 = scalar_lea.hbm %s943_s24, 128  ;;  %s948_s7 = scalar_lea.hbm %s1384_s3, 512 }
 0x166   : > { %691 = vst.msk [vmem:[%s1262_s12 + $0x78] sm:$0xff] %vm347_vm1, %v440_v32  ;;  %v438_v33 = vpop.permute.xlu0 %437  ;;  %p945_p10 = scmp.ne.s32.totalorder %s943_s24, %s944_s26  ;;  %p949_p11 = scmp.lt.s32.totalorder %s943_s24, %s1384_s3 }
 0x167   : > { %690 = vst.msk [vmem:[%s1262_s12 + $0x70] sm:$0xff] %vm347_vm1, %v438_v33  ;;  %p950_p2 = scmp.lt.s32.totalorder %s948_s7, %s944_s26 }
 0x168   : > { %p946_p3 = pnand %p945_p10, %p1181_p9 }
 0x169   : > { %p951_p6 = por %p950_p2, %p949_p11 }
 0x16a   : > { %p947_p12 = pneg %p946_p3 }
 0x16c   : > { %p952_p8 = pnand %p951_p6, %p947_p12 }
 0x16e   : > { %955 = shalt.err (!%p952_p8)
}
 0x16f   : > { %720 = dma.vmem_to_hbm [thread:$0]  (%p1181_p9), %s492_s28, 2048, %s494_s19, %s452_s0, %s1071_s11, %s1071_s11, %s1072_s27  }
 0x170 PF: > { %s1404_s30 = sld [smem:[#allocation14_spill]]  ;;  %p738_p0 = scmp.ge.s32.totalorder %s1058_s22, 2 }
 0x172   : > { %p731_p1 = pnand %p738_p0, %p1191_p13 }
 0x174   : > { %p732_p4 = pneg %p731_p1 }
 0x176   : > { %s508_s10 = sand.u32 1, %s1404_s30  }
 0x177   : > { %s509_s23 = scalar_lea.sflag [#allocation4], %s508_s10 }
 0x178   : > { %1009 = dma.done.wait (%p732_p4), %s509_s23, 1024  }
 0x179   : > { %1011 = vsyncadd (%p732_p4), %s509_s23, 4294966272  ;;  %s519_s6 = scalar_lea.sflag [#allocation9], %s508_s10 }
 0x17a   : > { %1013 = dma.done.wait (%p732_p4), %s519_s6, 2048  }
 0x17b   : > { %1015 = vsyncadd (%p732_p4), %s519_s6, 4294965248  ;;  %s26_s22 = sadd.s32 1, %s1058_s22   ;;  %s1406_s5 = sld [smem:[#allocation15_spill]] }
 0x17c   : > { %p23_p5 = scmp.ge.s32.totalorder %s26_s22, 6   ;;  %s1407_s25 = sld [smem:[#allocation16_spill]] }
 0x17d   : > { %s1408_s12 = smov %s1022_s13  ;;  %s1409_s13 = smov %s1026_s14 }
 0x17e   : > { %s1410_s14 = smov %s1221_s29  ;;  %s1411_s15 = smov %s1034_s16 }
 0x17f   : > { %s1412_s16 = smov %s1038_s17  ;;  %s1413_s17 = smov %s1197_s9 }
 0x180   : > { %s1414_s18 = smov %s1050_s20  ;;  %s1415_s19 = smov %s1054_s21 }
 0x181   : > { %s1416_s20 = smov %s1406_s5  ;;  %25 = sbr.rel (!%p23_p5) target bundleno = 15 (0xf), region = 113 }
 0x182   : > { %s1417_s21 = smov %s1407_s25 }
 0x186   :  { %525 = vsyncpa [#allocation3], 1 }
 0x187   :  { %527 = vsyncpa [#allocation3 + $0x1], 1 }
 0x188   :  { %528 = vsyncpa [#allocation6], 1 }
 0x189   :  { %530 = vsyncpa [#allocation6 + $0x1], 1 }
 0x18a   :  { %531 = vsyncpa [#allocation4], 1 }
 0x18b   :  { %533 = vsyncpa [#allocation4 + $0x1], 1 }
 0x18c   :  { %534 = vsyncpa [#allocation9], 1 }
 0x18d   :  { %536 = vsyncpa [#allocation9 + $0x1], 1 }

</bundles_post_ra>
